<compile_context>
chip_gen: v6e
topology: v6e:2x2x1
jax: 0.10.0
libtpu: 0.0.40
codegen_flags: <defaults>
</compile_context>

<pallas_src>
import functools

import jax
import jax.numpy as jnp
from jax import lax
from jax.experimental import pallas as pl
from jax.experimental.pallas import tpu as pltpu

EPS = 1e-5
_VMEM_LIMIT = 32 * 1024 * 1024

# Flipped to False at runtime if the lane-dense (oh*ow, C) -> (oh, ow*C) vreg
# relayout is not supported by the installed Mosaic; we then fall back to the
# natural NHWC output block (semantically identical).
_LANE_DENSE_OUT = True


# ---------------------------------------------------------------------------
# Kernel 1: per-channel BatchNorm batch statistics -> (scale, shift)
# ---------------------------------------------------------------------------

def _bn_stats_kernel(x_ref, g_ref, b_ref, o_ref, acc_ref, *, inv_count):
    """Accumulate sum / sum-of-squares over row tiles; finalize scale/shift."""
    i = pl.program_id(0)

    @pl.when(i == 0)
    def _():
        acc_ref[...] = jnp.zeros_like(acc_ref)

    xb = x_ref[...]                                             # (tile, C) f32
    acc_ref[0:1, :] += jnp.sum(xb, axis=0, keepdims=True)
    acc_ref[1:2, :] += jnp.sum(xb * xb, axis=0, keepdims=True)

    @pl.when(i == pl.num_programs(0) - 1)
    def _():
        mean = acc_ref[0:1, :] * inv_count
        var = jnp.maximum(acc_ref[1:2, :] * inv_count - mean * mean, 0.0)
        scale = g_ref[...] * lax.rsqrt(var + EPS)
        o_ref[0:1, :] = scale
        o_ref[1:2, :] = b_ref[...] - mean * scale


def _pick_row_tile(r, max_rows=1024):
    for t in (max_rows, 512, 256, 128, 64, 32, 16, 8):
        if t <= r and r % t == 0:
            return t
    return r


def _bn_scale_shift(x_nhwc, gamma, beta):
    """Training-mode BN batch statistics, reduced to per-channel scale/shift."""
    n, h, w, c = x_nhwc.shape
    r = n * h * w
    x2 = x_nhwc.reshape(r, c)
    tile = _pick_row_tile(r)
    kernel = functools.partial(_bn_stats_kernel, inv_count=1.0 / r)
    return pl.pallas_call(
        kernel,
        out_shape=jax.ShapeDtypeStruct((2, c), jnp.float32),
        grid_spec=pltpu.PrefetchScalarGridSpec(
            num_scalar_prefetch=0,
            grid=(r // tile,),
            in_specs=[
                pl.BlockSpec((tile, c), lambda i: (i, 0)),
                pl.BlockSpec((1, c), lambda i: (0, 0)),
                pl.BlockSpec((1, c), lambda i: (0, 0)),
            ],
            out_specs=pl.BlockSpec((2, c), lambda i: (0, 0)),
            scratch_shapes=[pltpu.VMEM((2, c), jnp.float32)],
        ),
        compiler_params=pltpu.CompilerParams(
            dimension_semantics=("arbitrary",),        # reduction axis
            vmem_limit_bytes=_VMEM_LIMIT),
    )(x2,
      gamma.reshape(1, c).astype(jnp.float32),
      beta.reshape(1, c).astype(jnp.float32))


# ---------------------------------------------------------------------------
# Kernel 2: fused  BN(scale/shift) -> ReLU -> 3x3 conv  [-> + shortcut]
# ---------------------------------------------------------------------------

def _im2col_to_scratch(pscr, patch_scr, oh, ow, stride):
    """Assemble the (oh*ow, 9*C) im2col matrix into VMEM scratch.

    stride == 2 uses the 4 even/odd phases (strided pl.ds reads) so every tap
    becomes a contiguous window, instead of 9 per-tap strided slices.
    """
    c = pscr.shape[-1]
    dt = patch_scr.dtype

    def put(t, tap):
        patch_scr[:, t * c:(t + 1) * c] = tap.reshape(oh * ow, c).astype(dt)

    if stride == 1:
        for kh in range(3):
            for kw in range(3):
                put(kh * 3 + kw, pscr[kh:kh + oh, kw:kw + ow, :])
    else:  # stride == 2
        phase = {}
        for rh in (0, 1):
            for rw in (0, 1):
                phase[(rh, rw)] = pscr[pl.ds(rh, oh + 1, 2),
                                       pl.ds(rw, ow + 1, 2), :]
        for kh in range(3):
            for kw in range(3):
                p = phase[(kh % 2, kw % 2)]
                put(kh * 3 + kw,
                    p[kh // 2:kh // 2 + oh, kw // 2:kw // 2 + ow, :])


def _bn_relu_conv_kernel(x_ref, ss_ref, w_ref, *rest,
                         stride, shortcut, out_h, out_w, fold_output):
    """One batch image: BN (pre-reduced scale/shift) + ReLU + 3x3 conv
    (+ 1x1-conv / identity shortcut and residual add)."""
    if shortcut == "conv":
        sc_ref, w3_ref, o_ref, pscr, patch_scr = rest
    elif shortcut == "identity":
        sc_ref, o_ref, pscr, patch_scr = rest
        w3_ref = None
    else:
        o_ref, pscr, patch_scr = rest
        sc_ref = w3_ref = None

    h, w, c_in = x_ref.shape
    c_out = w_ref.shape[1]
    zdt = pscr.dtype

    # Zero the 1-pixel padding ring of the persistent scratch.  Done every grid
    # step (cheap) so the kernel stays correct when the batch axis is sharded
    # across TensorCores ("parallel" megacore semantics on v7x).
    pscr[0:1, :, :] = jnp.zeros((1, w + 2, c_in), zdt)
    pscr[h + 1:h + 2, :, :] = jnp.zeros((1, w + 2, c_in), zdt)
    pscr[:, 0:1, :] = jnp.zeros((h + 2, 1, c_in), zdt)
    pscr[:, w + 1:w + 2, :] = jnp.zeros((h + 2, 1, c_in), zdt)

    # BatchNorm (batch statistics pre-reduced to per-channel scale/shift) + ReLU
    # in f32, then a single sliced store into the scratch interior (replaces the
    # concatenate-based padding of the previous version).
    xb = x_ref[...]
    scale = ss_ref[0:1, :].reshape(1, 1, c_in)
    shift = ss_ref[1:2, :].reshape(1, 1, c_in)
    act = jnp.maximum(xb * scale + shift, 0.0)
    pscr[1:h + 1, 1:w + 1, :] = act

    # One fused im2col MXU matmul with K = 9*c_in instead of 9 tiny-K dots.
    _im2col_to_scratch(pscr, patch_scr, out_h, out_w, stride)
    y = jnp.dot(patch_scr[...], w_ref[...],
                preferred_element_type=jnp.float32)             # (oh*ow, c_out) f32

    if shortcut == "conv":
        xs = sc_ref[...].reshape(out_h * out_w, sc_ref.shape[-1])
        y = y + jnp.dot(xs.astype(w3_ref.dtype), w3_ref[...],
                        preferred_element_type=jnp.float32)
    elif shortcut == "identity":
        y = y + sc_ref[...].reshape(out_h * out_w, c_out)

    if fold_output:
        # Lane-dense store: fold (oh*ow, c_out) -> (oh, ow*c_out) so the minor
        # dim fills the 128-lane dimension (big win when c_out < 128).
        o_ref[...] = y.reshape(out_h, out_w * c_out)
    else:
        o_ref[...] = y.reshape(out_h, out_w, c_out)


def _fused_stage_impl(x_nhwc, ss, w_i2c, *, stride, ch_out,
                      shortcut, sc, w3, fold_output):
    n, h, w, c_in = x_nhwc.shape
    oh, ow = h // stride, w // stride
    compute_dtype = w_i2c.dtype

    in_specs = [
        pl.BlockSpec((None, h, w, c_in), lambda i: (i, 0, 0, 0)),   # x / y1 image
        pl.BlockSpec((2, c_in), lambda i: (0, 0)),                  # BN scale/shift
        pl.BlockSpec(w_i2c.shape, lambda i: (0, 0)),                # im2col weights
    ]
    args = [x_nhwc, ss, w_i2c]
    if shortcut is not None:
        c_sc = sc.shape[-1]
        in_specs.append(pl.BlockSpec((None, oh, ow, c_sc), lambda i: (i, 0, 0, 0)))
        args.append(sc)
    if shortcut == "conv":
        in_specs.append(pl.BlockSpec(w3.shape, lambda i: (0, 0)))
        args.append(w3)

    if fold_output:
        out_shape = jax.ShapeDtypeStruct((n, oh, ow * ch_out), jnp.float32)
        out_spec = pl.BlockSpec((None, oh, ow * ch_out), lambda i: (i, 0, 0))
    else:
        out_shape = jax.ShapeDtypeStruct((n, oh, ow, ch_out), jnp.float32)
        out_spec = pl.BlockSpec((None, oh, ow, ch_out), lambda i: (i, 0, 0, 0))

    kernel = functools.partial(
        _bn_relu_conv_kernel, stride=stride, shortcut=shortcut,
        out_h=oh, out_w=ow, fold_output=fold_output)

    out = pl.pallas_call(
        kernel,
        out_shape=out_shape,
        grid_spec=pltpu.PrefetchScalarGridSpec(
            num_scalar_prefetch=0,
            grid=(n,),
            in_specs=in_specs,
            out_specs=out_spec,
            scratch_shapes=[
                pltpu.VMEM((h + 2, w + 2, c_in), jnp.float32),      # padded act
                pltpu.VMEM((oh * ow, 9 * c_in), compute_dtype),     # im2col matrix
            ],
        ),
        compiler_params=pltpu.CompilerParams(
            dimension_semantics=("parallel",),      # shard batch across TCs (v7x)
            vmem_limit_bytes=_VMEM_LIMIT),
    )(*args)
    # Row-major re-view back to NHWC (free for the folded layout).
    return out.reshape(n, oh, ow, ch_out)


def _fused_stage(x_nhwc, ss, w_i2c, *, stride, ch_out,
                 shortcut=None, sc=None, w3=None):
    global _LANE_DENSE_OUT
    if _LANE_DENSE_OUT:
        try:
            return _fused_stage_impl(x_nhwc, ss, w_i2c, stride=stride,
                                     ch_out=ch_out, shortcut=shortcut, sc=sc,
                                     w3=w3, fold_output=True)
        except Exception:
            # Fall back to the natural NHWC output block if the lane-dense
            # relayout cannot be lowered by this toolchain version.
            _LANE_DENSE_OUT = False
    return _fused_stage_impl(x_nhwc, ss, w_i2c, stride=stride, ch_out=ch_out,
                             shortcut=shortcut, sc=sc, w3=w3, fold_output=False)


# ---------------------------------------------------------------------------
# Public wrapper (PyTorch NCHW / OIHW at the boundary)
# ---------------------------------------------------------------------------

def wrn_layer_forward(x_nchw, params, *, stride=1, compute_dtype=jnp.bfloat16):
    # TODO(synk): dropout branches (p_drop > 0) not implemented; module default
    #             p_drop=0 skips them, so forward semantics are unchanged.
    n, ch_in, hh, ww = x_nchw.shape
    ch_out = params["w1"].shape[0]
    conv_shortcut = ch_in != ch_out
    if stride not in (1, 2):
        raise ValueError("wrn_layer uses stride 1 or 2")
    if hh % stride or ww % stride:
        raise ValueError("spatial dims must be divisible by stride")
    if (not conv_shortcut) and stride != 1:
        raise ValueError("identity shortcut requires stride == 1")
    oh, ow = hh // stride, ww // stride

    x_nhwc = jnp.transpose(x_nchw, (0, 2, 3, 1)).astype(jnp.float32)

    # OIHW -> HWIO -> flattened im2col layout (9*Cin, Cout); cast for the MXU.
    w1 = jnp.transpose(params["w1"], (2, 3, 1, 0)).reshape(9 * ch_in, ch_out)
    w2 = jnp.transpose(params["w2"], (2, 3, 1, 0)).reshape(9 * ch_out, ch_out)
    w1 = w1.astype(compute_dtype)
    w2 = w2.astype(compute_dtype)

    # bn1 batch stats -> scale/shift, then bn1+relu+conv1 (3x3, stride, pad 1).
    ss1 = _bn_scale_shift(x_nhwc, params["g1"], params["b1"])
    y1 = _fused_stage(x_nhwc, ss1, w1, stride=stride, ch_out=ch_out)

    # bn2 batch stats, then bn2+relu+conv2 (3x3, stride 1) + shortcut + residual.
    ss2 = _bn_scale_shift(y1, params["g2"], params["b2"])
    if conv_shortcut:
        sc = x_nhwc[:, ::stride, ::stride, :] if stride > 1 else x_nhwc
        w3 = jnp.transpose(params["w3"][:, :, 0, 0], (1, 0)).astype(compute_dtype)
        out = _fused_stage(y1, ss2, w2, stride=1, ch_out=ch_out,
                           shortcut="conv", sc=sc, w3=w3)
    else:
        out = _fused_stage(y1, ss2, w2, stride=1, ch_out=ch_out,
                           shortcut="identity", sc=x_nhwc)

    return jnp.transpose(out, (0, 3, 1, 2))                       # back to NCHW


# ---------------------------------------------------------------------------
# Params / pure-JAX reference / test harness
# ---------------------------------------------------------------------------

def init_params(key, ch_in, ch_out):
    ks = jax.random.split(key, 7)
    w1 = jax.random.normal(ks[0], (ch_out, ch_in, 3, 3), jnp.float32) * (2.0 / (ch_in * 9)) ** 0.5
    w2 = jax.random.normal(ks[1], (ch_out, ch_out, 3, 3), jnp.float32) * (2.0 / (ch_out * 9)) ** 0.5
    w3 = jax.random.normal(ks[2], (ch_out, ch_in, 1, 1), jnp.float32) * (2.0 / ch_in) ** 0.5
    g1 = 1.0 + 0.1 * jax.random.normal(ks[3], (ch_in,), jnp.float32)
    b1 = 0.1 * jax.random.normal(ks[4], (ch_in,), jnp.float32)
    g2 = 1.0 + 0.1 * jax.random.normal(ks[5], (ch_out,), jnp.float32)
    b2 = 0.1 * jax.random.normal(ks[6], (ch_out,), jnp.float32)
    return dict(w1=w1, w2=w2, w3=w3, g1=g1, b1=b1, g2=g2, b2=b2)


def ref_forward(x_nchw, params, *, stride=1):
    """Pure-JAX reference mirroring the PyTorch module (NCHW / OIHW)."""
    def bn_relu(x, g, b):
        mean = jnp.mean(x, axis=(0, 2, 3), keepdims=True)
        var = jnp.mean(jnp.square(x - mean), axis=(0, 2, 3), keepdims=True)
        y = (x - mean) * lax.rsqrt(var + EPS) * g.reshape(1, -1, 1, 1) + b.reshape(1, -1, 1, 1)
        return jnp.maximum(y, 0.0)

    def conv(x, w, s, pad):
        return lax.conv_general_dilated(
            x, w, (s, s), [(pad, pad), (pad, pad)],
            dimension_numbers=("NCHW", "OIHW", "NCHW"))

    ch_in = x_nchw.shape[1]
    ch_out = params["w1"].shape[0]
    h = bn_relu(x_nchw, params["g1"], params["b1"])
    h = conv(h, params["w1"], stride, 1)
    h = bn_relu(h, params["g2"], params["b2"])
    h = conv(h, params["w2"], 1, 1)
    sc = conv(x_nchw, params["w3"], stride, 0) if ch_in != ch_out else x_nchw
    return h + sc


if __name__ == "__main__":
    root = jax.random.PRNGKey(0)

    # (name, ch_in, ch_out, spatial, stride, matmul dtype, atol, rtol)
    cases = [
        ("conv_shortcut_f32",       4,  8, 16, 1, jnp.float32,  1e-3, 1e-3),
        ("conv_shortcut_bf16",      4,  8, 16, 1, jnp.bfloat16, 1e-1, 1e-1),
        ("identity_shortcut_f32",   8,  8, 16, 1, jnp.float32,  1e-3, 1e-3),
        ("strided_conv_short_f32",  8, 16, 16, 2, jnp.float32,  1e-3, 1e-3),
    ]
    for idx, (name, ci, co, sp, st, cdt, atol, rtol) in enumerate(cases):
        kx, kp = jax.random.split(jax.random.fold_in(root, idx))
        x = jax.random.normal(kx, (2, ci, sp, sp), jnp.float32)
        params = init_params(kp, ci, co)

        out = wrn_layer_forward(x, params, stride=st, compute_dtype=cdt)
        out = jax.block_until_ready(out)

        ref = ref_forward(x, params, stride=st)
        assert out.shape == ref.shape, (name, out.shape, ref.shape)
        if not jnp.allclose(out, ref, atol=atol, rtol=rtol):
            max_err = float(jnp.max(jnp.abs(out - ref)))
            raise AssertionError(f"{name}: Pallas mismatch, max abs err = {max_err}")

    print("KERNEL_OK")
</pallas_src>

<mosaic_0001>
module attributes {stable_mosaic.version = 11 : i64} {
  func.func @_bn_stats_kernel(%arg0: i32, %arg1: memref<512x4xf32, #tpu.memory_space<vmem>>, %arg2: memref<1x4xf32, #tpu.memory_space<vmem>>, %arg3: memref<1x4xf32, #tpu.memory_space<vmem>>, %arg4: memref<2x4xf32, #tpu.memory_space<vmem>>, %arg5: memref<2x4xf32, #tpu.memory_space<vmem>>) attributes {dimension_semantics = [#tpu.dimension_semantics<arbitrary>], iteration_bounds = array<i64: 1>, scalar_prefetch = 0 : i64, scratch_operands = 1 : i64, tpu.core_type = #tpu.core_type<tc>, window_params = [{transform_indices = @transform_0, window_bounds = array<i64: 512, 4>}, {pipeline_mode = #tpu.pipeline_mode<synchronous>, transform_indices = @transform_1, window_bounds = array<i64: 1, 4>}, {pipeline_mode = #tpu.pipeline_mode<synchronous>, transform_indices = @transform_2, window_bounds = array<i64: 1, 4>}, {pipeline_mode = #tpu.pipeline_mode<synchronous>, transform_indices = @transform_3, window_bounds = array<i64: 2, 4>}]} {
    %c0_i32 = arith.constant 0 : i32
    %0 = arith.cmpi eq, %arg0, %c0_i32 : i32
    %1 = arith.extui %0 : i1 to i32
    %c0_i32_0 = arith.constant 0 : i32
    %2 = arith.cmpi ne, %1, %c0_i32_0 : i32
    scf.if %2 {
      %cst_12 = arith.constant 0.000000e+00 : f32
      %18 = vector.broadcast %cst_12 : f32 to vector<2x4xf32>
      %c0_13 = arith.constant 0 : index
      %c0_14 = arith.constant 0 : index
      %19 = vector.load %arg5[%c0_13, %c0_14] : memref<2x4xf32, #tpu.memory_space<vmem>>, vector<2x4xf32>
      tpu.vector_store %arg5[%c0_13, %c0_14], %18 {strides = array<i32>} : memref<2x4xf32, #tpu.memory_space<vmem>>, vector<2x4xf32>,
    } else {
    }
    %c0 = arith.constant 0 : index
    %c0_1 = arith.constant 0 : index
    %3 = vector.load %arg1[%c0, %c0_1] : memref<512x4xf32, #tpu.memory_space<vmem>>, vector<512x4xf32>
    %c0_2 = arith.constant 0 : index
    %c0_3 = arith.constant 0 : index
    %4 = vector.load %arg5[%c0_2, %c0_3] : memref<2x4xf32, #tpu.memory_space<vmem>>, vector<1x4xf32>
    %cst = arith.constant dense<0.000000e+00> : vector<4xf32>
    %5 = vector.multi_reduction <add>, %3, %cst [0] : vector<512x4xf32> to vector<4xf32>
    %6 = vector.shape_cast %5 : vector<4xf32> to vector<1x4xf32>
    %7 = arith.addf %4, %6 : vector<1x4xf32>
    %c0_4 = arith.constant 0 : index
    %c0_5 = arith.constant 0 : index
    %8 = vector.load %arg5[%c0_4, %c0_5] : memref<2x4xf32, #tpu.memory_space<vmem>>, vector<1x4xf32>
    tpu.vector_store %arg5[%c0_4, %c0_5], %7 {strides = array<i32>} : memref<2x4xf32, #tpu.memory_space<vmem>>, vector<1x4xf32>,
    %c1 = arith.constant 1 : index
    %c0_6 = arith.constant 0 : index
    %9 = vector.load %arg5[%c1, %c0_6] : memref<2x4xf32, #tpu.memory_space<vmem>>, vector<1x4xf32>
    %10 = arith.mulf %3, %3 : vector<512x4xf32>
    %cst_7 = arith.constant dense<0.000000e+00> : vector<4xf32>
    %11 = vector.multi_reduction <add>, %10, %cst_7 [0] : vector<512x4xf32> to vector<4xf32>
    %12 = vector.shape_cast %11 : vector<4xf32> to vector<1x4xf32>
    %13 = arith.addf %9, %12 : vector<1x4xf32>
    %c1_8 = arith.constant 1 : index
    %c0_9 = arith.constant 0 : index
    %14 = vector.load %arg5[%c1_8, %c0_9] : memref<2x4xf32, #tpu.memory_space<vmem>>, vector<1x4xf32>
    tpu.vector_store %arg5[%c1_8, %c0_9], %13 {strides = array<i32>} : memref<2x4xf32, #tpu.memory_space<vmem>>, vector<1x4xf32>,
    %c0_i32_10 = arith.constant 0 : i32
    %15 = arith.cmpi eq, %arg0, %c0_i32_10 : i32
    %16 = arith.extui %15 : i1 to i32
    %c0_i32_11 = arith.constant 0 : i32
    %17 = arith.cmpi ne, %16, %c0_i32_11 : i32
    scf.if %17 {
      %c0_12 = arith.constant 0 : index
      %c0_13 = arith.constant 0 : index
      %18 = vector.load %arg5[%c0_12, %c0_13] : memref<2x4xf32, #tpu.memory_space<vmem>>, vector<1x4xf32>
      %cst_14 = arith.constant 0.001953125 : f32
      %19 = vector.broadcast %cst_14 : f32 to vector<1x4xf32>
      %20 = arith.mulf %18, %19 : vector<1x4xf32>
      %c1_15 = arith.constant 1 : index
      %c0_16 = arith.constant 0 : index
      %21 = vector.load %arg5[%c1_15, %c0_16] : memref<2x4xf32, #tpu.memory_space<vmem>>, vector<1x4xf32>
      %cst_17 = arith.constant 0.001953125 : f32
      %22 = vector.broadcast %cst_17 : f32 to vector<1x4xf32>
      %23 = arith.mulf %21, %22 : vector<1x4xf32>
      %24 = arith.mulf %20, %20 : vector<1x4xf32>
      %25 = arith.subf %23, %24 : vector<1x4xf32>
      %cst_18 = arith.constant 0.000000e+00 : f32
      %26 = vector.broadcast %cst_18 : f32 to vector<1x4xf32>
      %27 = arith.maximumf %25, %26 : vector<1x4xf32>
      %c0_19 = arith.constant 0 : index
      %c0_20 = arith.constant 0 : index
      %28 = vector.load %arg2[%c0_19, %c0_20] : memref<1x4xf32, #tpu.memory_space<vmem>>, vector<1x4xf32>
      %cst_21 = arith.constant 9.99999974E-6 : f32
      %29 = vector.broadcast %cst_21 : f32 to vector<1x4xf32>
      %30 = arith.addf %27, %29 : vector<1x4xf32>
      %31 = math.rsqrt %30 : vector<1x4xf32>
      %32 = arith.mulf %28, %31 : vector<1x4xf32>
      %c0_22 = arith.constant 0 : index
      %c0_23 = arith.constant 0 : index
      %33 = vector.load %arg4[%c0_22, %c0_23] : memref<2x4xf32, #tpu.memory_space<vmem>>, vector<1x4xf32>
      tpu.vector_store %arg4[%c0_22, %c0_23], %32 {strides = array<i32>} : memref<2x4xf32, #tpu.memory_space<vmem>>, vector<1x4xf32>,
      %c0_24 = arith.constant 0 : index
      %c0_25 = arith.constant 0 : index
      %34 = vector.load %arg3[%c0_24, %c0_25] : memref<1x4xf32, #tpu.memory_space<vmem>>, vector<1x4xf32>
      %35 = arith.mulf %20, %32 : vector<1x4xf32>
      %36 = arith.subf %34, %35 : vector<1x4xf32>
      %c1_26 = arith.constant 1 : index
      %c0_27 = arith.constant 0 : index
      %37 = vector.load %arg4[%c1_26, %c0_27] : memref<2x4xf32, #tpu.memory_space<vmem>>, vector<1x4xf32>
      tpu.vector_store %arg4[%c1_26, %c0_27], %36 {strides = array<i32>} : memref<2x4xf32, #tpu.memory_space<vmem>>, vector<1x4xf32>,
    } else {
    }
    return
  }
  func.func @transform_0(%arg0: i32) -> (i32, i32) {
    %c0_i32 = arith.constant 0 : i32
    %c0_i32_0 = arith.constant 0 : i32
    return %arg0, %c0_i32 : i32, i32
  }
  func.func @transform_1(%arg0: i32) -> (i32, i32) {
    %c0_i32 = arith.constant 0 : i32
    %c0_i32_0 = arith.constant 0 : i32
    %c0_i32_1 = arith.constant 0 : i32
    return %c0_i32, %c0_i32_0 : i32, i32
  }
  func.func @transform_2(%arg0: i32) -> (i32, i32) {
    %c0_i32 = arith.constant 0 : i32
    %c0_i32_0 = arith.constant 0 : i32
    %c0_i32_1 = arith.constant 0 : i32
    return %c0_i32, %c0_i32_0 : i32, i32
  }
  func.func @transform_3(%arg0: i32) -> (i32, i32) {
    %c0_i32 = arith.constant 0 : i32
    %c0_i32_0 = arith.constant 0 : i32
    %c0_i32_1 = arith.constant 0 : i32
    return %c0_i32, %c0_i32_0 : i32, i32
  }
}

</mosaic_0001>

<bundles_post_ra>
// kernel: tpu_custom_call.1
= control target key start
LH: loop header
LB: loop body
LE: loop exit
PB: predicated region body
PF: predicated region fallthrough
CT: control target
= control target key end

     0   :  { %8 = vsyncpa [#allocation4], 0  ;;  %vm19_vm0 = vcmask 25600   ;;  %v482_v2 = vmov 0.0   ;;  %vm86_vm1 = vcmask 31744   ;;  %vm221_vm2 = vcmask 24576   ;;  %s1132_s0 = inlined_call_operand.vmem [shape: f32[512,4], index: 0, kind: input, shape index: {}]   ;;  %s1133_s1 = inlined_call_operand.vmem [shape: f32[1,4], index: 1, kind: input, shape index: {}]   ;;  %s1134_s2 = inlined_call_operand.vmem [shape: f32[1,4], index: 2, kind: input, shape index: {}]   ;;  %s1135_s3 = inlined_call_operand.hbm [shape: f32[2,4], index: 3, kind: output, shape index: {}]  }
   0x1   :  { %v21_v0 = vld [vmem:[%s1132_s0] sm:$0xff]  ;;  %v22_v1 = vld [vmem:[%s1132_s0 + $0x8] sm:$0xff]  ;;  %20 = vst.msk [vmem:[#allocation2] sm:$0x3] %vm19_vm0, %v482_v2  ;;  %v23_v3 = vld [vmem:[%s1132_s0 + $0x10] sm:$0xff]  ;;  %s483_s8 = smov [#allocation3]  }
   0x2   :  { %v24_v4 = vld [vmem:[%s1132_s0 + $0x18] sm:$0xff]  ;;  %v87_v5 = vsel %vm86_vm1, %v21_v0, 0.0  ;;  %v88_v6 = vsel %vm86_vm1, %v22_v1, 0.0  ;;  %v90_v7 = vsel %vm86_vm1, %v23_v3, 0.0  ;;  %v25_v8 = vld [vmem:[%s1132_s0 + $0x20] sm:$0xff]  ;;  %v526_v11 = vld [vmem:[%s1132_s0 + $0x28] sm:$0xff]  ;;  %v224_v56 = vmul.f32 %v21_v0, %v21_v0 }
   0x3   :  { %v89_v9 = vadd.f32 %v88_v6, %v87_v5  ;;  %v92_v10 = vsel %vm86_vm1, %v24_v4, 0.0  ;;  %v94_v13 = vsel %vm86_vm1, %v25_v8, 0.0  ;;  %v532_v14 = vld [vmem:[%s1132_s0 + $0x30] sm:$0xff]  ;;  %v96_v16 = vsel %vm86_vm1, %v526_v11, 0.0  ;;  %v539_v17 = vld [vmem:[%s1132_s0 + $0x38] sm:$0xff]  ;;  %v546_v20 = vld [vmem:[%s1132_s0 + $0x40] sm:$0xff] }
   0x4   :  { %v98_v19 = vsel %vm86_vm1, %v532_v14, 0.0  ;;  %v100_v22 = vsel %vm86_vm1, %v539_v17, 0.0  ;;  %v553_v23 = vld [vmem:[%s1132_s0 + $0x48] sm:$0xff]  ;;  %v102_v25 = vsel %vm86_vm1, %v546_v20, 0.0  ;;  %v560_v26 = vld [vmem:[%s1132_s0 + $0x50] sm:$0xff]  ;;  %v567_v29 = vld [vmem:[%s1132_s0 + $0x58] sm:$0xff]  ;;  %v225_v57 = vmul.f32 %v22_v1, %v22_v1 }
   0x5   :  { %v91_v12 = vadd.f32 %v90_v7, %v89_v9  ;;  %v104_v28 = vsel %vm86_vm1, %v553_v23, 0.0  ;;  %v106_v31 = vsel %vm86_vm1, %v560_v26, 0.0  ;;  %v574_v32 = vld [vmem:[%s1132_s0 + $0x60] sm:$0xff]  ;;  %v108_v34 = vsel %vm86_vm1, %v567_v29, 0.0  ;;  %v581_v35 = vld [vmem:[%s1132_s0 + $0x68] sm:$0xff]  ;;  %v588_v38 = vld [vmem:[%s1132_s0 + $0x70] sm:$0xff] }
   0x6   :  { %v110_v37 = vsel %vm86_vm1, %v574_v32, 0.0  ;;  %v112_v40 = vsel %vm86_vm1, %v581_v35, 0.0  ;;  %v595_v41 = vld [vmem:[%s1132_s0 + $0x78] sm:$0xff]  ;;  %v114_v43 = vsel %vm86_vm1, %v588_v38, 0.0  ;;  %v602_v44 = vld [vmem:[%s1132_s0 + $0x80] sm:$0xff]  ;;  %v609_v47 = vld [vmem:[%s1132_s0 + $0x88] sm:$0xff]  ;;  %v226_v58 = vmul.f32 %v23_v3, %v23_v3 }
   0x7   :  { %v93_v15 = vadd.f32 %v92_v10, %v91_v12  ;;  %v116_v46 = vsel %vm86_vm1, %v595_v41, 0.0  ;;  %v118_v49 = vsel %vm86_vm1, %v602_v44, 0.0  ;;  %v616_v50 = vld [vmem:[%s1132_s0 + $0x90] sm:$0xff]  ;;  %v120_v52 = vsel %vm86_vm1, %v609_v47, 0.0  ;;  %v623_v53 = vld [vmem:[%s1132_s0 + $0x98] sm:$0xff]  ;;  %v630_v59 = vld [vmem:[%s1132_s0 + $0xa0] sm:$0xff] }
   0x8   :  { %v122_v55 = vsel %vm86_vm1, %v616_v50, 0.0  ;;  %v124_v61 = vsel %vm86_vm1, %v623_v53, 0.0  ;;  %v227_v62 = vmul.f32 %v24_v4, %v24_v4  ;;  %v637_v63 = vld [vmem:[%s1132_s0 + $0xa8] sm:$0xff]  ;;  %v228_v5 = vmul.f32 %v25_v8, %v25_v8  ;;  %v647_v4 = vld [vmem:[%s1132_s0 + $0xb0] sm:$0xff]  ;;  %s448_s9 = sshll.u32 %s483_s8, 4  ;;  %s449_s9 = int_to_ptr.vmem [resolvable:$true] %s448_s9 }
   0x9   :  { %v95_v18 = vadd.f32 %v94_v13, %v93_v15  ;;  %v126_v0 = vsel %vm86_vm1, %v630_v59, 0.0  ;;  %v288_v1 = vsel %vm86_vm1, %v224_v56, 0.0  ;;  %v289_v3 = vsel %vm86_vm1, %v225_v57, 0.0  ;;  %v657_v13 = vld [vmem:[%s1132_s0 + $0xb8] sm:$0xff]  ;;  %s460_s10 = scalar_lea.vmem %s449_s9, 32  ;;  %p465_p1 = scmp.lt.s32.totalorder %s449_s9, %s449_s9 }
   0xa   :  { %v291_v6 = vsel %vm86_vm1, %v226_v58, 0.0  ;;  %v290_v9 = vadd.f32 %v289_v3, %v288_v1  ;;  %v128_v10 = vsel %vm86_vm1, %v637_v63, 0.0  ;;  %v229_v8 = vmul.f32 %v526_v11, %v526_v11  ;;  %v667_v11 = vld [vmem:[%s1132_s0 + $0xc0] sm:$0xff]  ;;  %p461_p0 = scmp.ne.s32.totalorder %s449_s9, %s460_s10  ;;  %p466_p2 = scmp.lt.s32.totalorder %s460_s10, %s460_s10 }
   0xb   :  { %v97_v21 = vadd.f32 %v96_v16, %v95_v18  ;;  %v293_v12 = vsel %vm86_vm1, %v227_v62, 0.0  ;;  %v130_v18 = vsel %vm86_vm1, %v647_v4, 0.0  ;;  %v235_v56 = vmul.f32 %v567_v29, %v567_v29  ;;  %v727_v29 = vld [vmem:[%s1132_s0 + $0xf0] sm:$0xff] }
   0xc   :  { %v292_v16 = vadd.f32 %v291_v6, %v290_v9  ;;  %v236_v62 = vmul.f32 %v574_v32, %v574_v32  ;;  %v237_v3 = vmul.f32 %v581_v35, %v581_v35  ;;  %v737_v32 = vld [vmem:[%s1132_s0 + $0xf8] sm:$0xff]  ;;  %v747_v35 = vld [vmem:[%s1132_s0 + $0x100] sm:$0xff]  ;;  %p467_p3 = por %p466_p2, %p465_p1 }
   0xd   :  { %v99_v24 = vadd.f32 %v98_v19, %v97_v21  ;;  %v230_v19 = vmul.f32 %v532_v14, %v532_v14  ;;  %v295_v21 = vsel %vm86_vm1, %v228_v5, 0.0  ;;  %v677_v14 = vld [vmem:[%s1132_s0 + $0xc8] sm:$0xff]  ;;  %v309_v6 = vsel %vm86_vm1, %v235_v56, 0.0 }
   0xe   :  { %v244_v56 = vmul.f32 %v630_v59, %v630_v59  ;;  %v817_v59 = vld [vmem:[%s1132_s0 + $0x138] sm:$0xff]  ;;  %p468_p4 = pnand %p467_p3, %p461_p0 }
   0xf   :  { %v101_v27 = vadd.f32 %v100_v22, %v99_v24  ;;  %v294_v24 = vadd.f32 %v293_v12, %v292_v16  ;;  %v311_v12 = vsel %vm86_vm1, %v236_v62, 0.0  ;;  %v245_v62 = vmul.f32 %v637_v63, %v637_v63  ;;  %v827_v63 = vld [vmem:[%s1132_s0 + $0x140] sm:$0xff] }
  0x11   :  { %v103_v30 = vadd.f32 %v102_v25, %v101_v27  ;;  %v132_v25 = vsel %vm86_vm1, %v657_v13, 0.0  ;;  %v231_v27 = vmul.f32 %v539_v17, %v539_v17  ;;  %v687_v17 = vld [vmem:[%s1132_s0 + $0xd0] sm:$0xff] }
  0x13   :  { %v105_v33 = vadd.f32 %v104_v28, %v103_v30  ;;  %v297_v28 = vsel %vm86_vm1, %v229_v8, 0.0  ;;  %v238_v8 = vmul.f32 %v588_v38, %v588_v38  ;;  %v757_v38 = vld [vmem:[%s1132_s0 + $0x108] sm:$0xff] }
  0x15   :  { %v107_v36 = vadd.f32 %v106_v31, %v105_v33  ;;  %v296_v31 = vadd.f32 %v295_v21, %v294_v24  ;;  %v134_v33 = vsel %vm86_vm1, %v667_v11, 0.0  ;;  %v313_v21 = vsel %vm86_vm1, %v237_v3, 0.0 }
  0x16   :  { %v246_v3 = vmul.f32 %v647_v4, %v647_v4  ;;  %v837_v4 = vld [vmem:[%s1132_s0 + $0x148] sm:$0xff] }
  0x17   :  { %v109_v39 = vadd.f32 %v108_v34, %v107_v36  ;;  %v232_v34 = vmul.f32 %v546_v20, %v546_v20  ;;  %v299_v36 = vsel %vm86_vm1, %v230_v19, 0.0  ;;  %v697_v20 = vld [vmem:[%s1132_s0 + $0xd8] sm:$0xff]  ;;  %v239_v19 = vmul.f32 %v595_v41, %v595_v41  ;;  %v767_v41 = vld [vmem:[%s1132_s0 + $0x110] sm:$0xff] }
  0x19   :  { %v111_v42 = vadd.f32 %v110_v37, %v109_v39  ;;  %v298_v39 = vadd.f32 %v297_v28, %v296_v31  ;;  %v315_v28 = vsel %vm86_vm1, %v238_v8, 0.0  ;;  %v247_v8 = vmul.f32 %v657_v13, %v657_v13  ;;  %v847_v13 = vld [vmem:[%s1132_s0 + $0x150] sm:$0xff] }
  0x1b   :  { %v113_v45 = vadd.f32 %v112_v40, %v111_v42  ;;  %v136_v40 = vsel %vm86_vm1, %v677_v14, 0.0  ;;  %v233_v42 = vmul.f32 %v553_v23, %v553_v23  ;;  %v707_v23 = vld [vmem:[%s1132_s0 + $0xe0] sm:$0xff] }
  0x1d   :  { %v115_v48 = vadd.f32 %v114_v43, %v113_v45  ;;  %v301_v43 = vsel %vm86_vm1, %v231_v27, 0.0  ;;  %v305_v57 = vsel %vm86_vm1, %v233_v42, 0.0  ;;  %v240_v27 = vmul.f32 %v602_v44, %v602_v44  ;;  %v777_v44 = vld [vmem:[%s1132_s0 + $0x118] sm:$0xff] }
  0x1e   :  { %v242_v42 = vmul.f32 %v616_v50, %v616_v50  ;;  %v797_v50 = vld [vmem:[%s1132_s0 + $0x128] sm:$0xff] }
  0x1f   :  { %v117_v51 = vadd.f32 %v116_v46, %v115_v48  ;;  %v300_v46 = vadd.f32 %v299_v36, %v298_v39  ;;  %v138_v48 = vsel %vm86_vm1, %v687_v17, 0.0  ;;  %v317_v36 = vsel %vm86_vm1, %v239_v19, 0.0 }
  0x20   :  { %v248_v19 = vmul.f32 %v667_v11, %v667_v11  ;;  %v857_v11 = vld [vmem:[%s1132_s0 + $0x158] sm:$0xff] }
  0x21   :  { %v119_v54 = vadd.f32 %v118_v49, %v117_v51  ;;  %v234_v49 = vmul.f32 %v560_v26, %v560_v26  ;;  %v303_v51 = vsel %vm86_vm1, %v232_v34, 0.0  ;;  %v717_v26 = vld [vmem:[%s1132_s0 + $0xe8] sm:$0xff]  ;;  %v241_v34 = vmul.f32 %v609_v47, %v609_v47  ;;  %v787_v47 = vld [vmem:[%s1132_s0 + $0x120] sm:$0xff] }
  0x22   :  { %v144_v1 = vsel %vm86_vm1, %v717_v26, 0.0 }
  0x23   :  { %v121_v60 = vadd.f32 %v120_v52, %v119_v54  ;;  %v302_v54 = vadd.f32 %v301_v43, %v300_v46  ;;  %v319_v43 = vsel %vm86_vm1, %v240_v27, 0.0  ;;  %v249_v27 = vmul.f32 %v677_v14, %v677_v14  ;;  %v867_v14 = vld [vmem:[%s1132_s0 + $0x160] sm:$0xff] }
  0x25   :  { %v123_v2 = vadd.f32 %v122_v55, %v121_v60  ;;  %v140_v55 = vsel %vm86_vm1, %v697_v20, 0.0  ;;  %v304_v60 = vadd.f32 %v303_v51, %v302_v54  ;;  %v321_v51 = vsel %vm86_vm1, %v241_v34, 0.0 }
  0x26   :  { %v250_v34 = vmul.f32 %v687_v17, %v687_v17  ;;  %v877_v17 = vld [vmem:[%s1132_s0 + $0x168] sm:$0xff] }
  0x27   :  { %v125_v7 = vadd.f32 %v124_v61, %v123_v2  ;;  %v142_v61 = vsel %vm86_vm1, %v707_v23, 0.0  ;;  %v307_v2 = vsel %vm86_vm1, %v234_v49, 0.0  ;;  %v243_v49 = vmul.f32 %v623_v53, %v623_v53  ;;  %v807_v53 = vld [vmem:[%s1132_s0 + $0x130] sm:$0xff] }
  0x29   :  { %v127_v15 = vadd.f32 %v126_v0, %v125_v7  ;;  %v306_v0 = vadd.f32 %v305_v57, %v304_v60  ;;  %v323_v57 = vsel %vm86_vm1, %v242_v42, 0.0  ;;  %v251_v42 = vmul.f32 %v697_v20, %v697_v20  ;;  %v887_v20 = vld [vmem:[%s1132_s0 + $0x170] sm:$0xff] }
  0x2b   :  { %v129_v22 = vadd.f32 %v128_v10, %v127_v15  ;;  %v308_v9 = vadd.f32 %v307_v2, %v306_v0  ;;  %v146_v10 = vsel %vm86_vm1, %v727_v29, 0.0  ;;  %v325_v2 = vsel %vm86_vm1, %v243_v49, 0.0 }
  0x2c   :  { %v252_v49 = vmul.f32 %v707_v23, %v707_v23  ;;  %v897_v23 = vld [vmem:[%s1132_s0 + $0x178] sm:$0xff] }
  0x2d   :  { %v131_v30 = vadd.f32 %v130_v18, %v129_v22  ;;  %v310_v16 = vadd.f32 %v309_v6, %v308_v9  ;;  %v148_v18 = vsel %vm86_vm1, %v737_v32, 0.0  ;;  %v327_v6 = vsel %vm86_vm1, %v244_v56, 0.0 }
  0x2e   :  { %v253_v56 = vmul.f32 %v717_v26, %v717_v26  ;;  %v907_v26 = vld [vmem:[%s1132_s0 + $0x180] sm:$0xff] }
  0x2f   :  { %v133_v37 = vadd.f32 %v132_v25, %v131_v30  ;;  %v312_v24 = vadd.f32 %v311_v12, %v310_v16  ;;  %v150_v25 = vsel %vm86_vm1, %v747_v35, 0.0  ;;  %v329_v12 = vsel %vm86_vm1, %v245_v62, 0.0 }
  0x30   :  { %v254_v62 = vmul.f32 %v727_v29, %v727_v29  ;;  %v917_v29 = vld [vmem:[%s1132_s0 + $0x188] sm:$0xff] }
  0x31   :  { %v135_v45 = vadd.f32 %v134_v33, %v133_v37  ;;  %v314_v31 = vadd.f32 %v313_v21, %v312_v24  ;;  %v152_v33 = vsel %vm86_vm1, %v757_v38, 0.0  ;;  %v331_v21 = vsel %vm86_vm1, %v246_v3, 0.0 }
  0x32   :  { %v255_v3 = vmul.f32 %v737_v32, %v737_v32  ;;  %v927_v32 = vld [vmem:[%s1132_s0 + $0x190] sm:$0xff] }
  0x33   :  { %v137_v52 = vadd.f32 %v136_v40, %v135_v45  ;;  %v316_v39 = vadd.f32 %v315_v28, %v314_v31  ;;  %v154_v40 = vsel %vm86_vm1, %v767_v41, 0.0  ;;  %v333_v28 = vsel %vm86_vm1, %v247_v8, 0.0 }
  0x34   :  { %v256_v8 = vmul.f32 %v747_v35, %v747_v35  ;;  %v937_v35 = vld [vmem:[%s1132_s0 + $0x198] sm:$0xff] }
  0x35   :  { %v139_v58 = vadd.f32 %v138_v48, %v137_v52  ;;  %v318_v46 = vadd.f32 %v317_v36, %v316_v39  ;;  %v156_v48 = vsel %vm86_vm1, %v777_v44, 0.0  ;;  %v335_v36 = vsel %vm86_vm1, %v248_v19, 0.0 }
  0x36   :  { %v257_v19 = vmul.f32 %v757_v38, %v757_v38  ;;  %v947_v38 = vld [vmem:[%s1132_s0 + $0x1a0] sm:$0xff] }
  0x37   :  { %v141_v5 = vadd.f32 %v140_v55, %v139_v58  ;;  %v320_v54 = vadd.f32 %v319_v43, %v318_v46  ;;  %v158_v55 = vsel %vm86_vm1, %v787_v47, 0.0  ;;  %v337_v43 = vsel %vm86_vm1, %v249_v27, 0.0 }
  0x38   :  { %v258_v27 = vmul.f32 %v767_v41, %v767_v41  ;;  %v957_v41 = vld [vmem:[%s1132_s0 + $0x1a8] sm:$0xff] }
  0x39   :  { %v143_v7 = vadd.f32 %v142_v61, %v141_v5  ;;  %v322_v60 = vadd.f32 %v321_v51, %v320_v54  ;;  %v160_v61 = vsel %vm86_vm1, %v797_v50, 0.0  ;;  %v339_v51 = vsel %vm86_vm1, %v250_v34, 0.0 }
  0x3a   :  { %v259_v34 = vmul.f32 %v777_v44, %v777_v44  ;;  %v967_v44 = vld [vmem:[%s1132_s0 + $0x1b0] sm:$0xff] }
  0x3b   :  { %v145_v15 = vadd.f32 %v144_v1, %v143_v7  ;;  %v324_v0 = vadd.f32 %v323_v57, %v322_v60  ;;  %v162_v1 = vsel %vm86_vm1, %v807_v53, 0.0  ;;  %v341_v57 = vsel %vm86_vm1, %v251_v42, 0.0 }
  0x3c   :  { %v260_v42 = vmul.f32 %v787_v47, %v787_v47  ;;  %v977_v47 = vld [vmem:[%s1132_s0 + $0x1b8] sm:$0xff] }
  0x3d   :  { %v147_v22 = vadd.f32 %v146_v10, %v145_v15  ;;  %v326_v9 = vadd.f32 %v325_v2, %v324_v0  ;;  %v164_v10 = vsel %vm86_vm1, %v817_v59, 0.0  ;;  %v343_v2 = vsel %vm86_vm1, %v252_v49, 0.0 }
  0x3e   :  { %v261_v49 = vmul.f32 %v797_v50, %v797_v50  ;;  %v987_v50 = vld [vmem:[%s1132_s0 + $0x1c0] sm:$0xff] }
  0x3f   :  { %v149_v30 = vadd.f32 %v148_v18, %v147_v22  ;;  %v328_v16 = vadd.f32 %v327_v6, %v326_v9  ;;  %v166_v18 = vsel %vm86_vm1, %v827_v63, 0.0  ;;  %v345_v6 = vsel %vm86_vm1, %v253_v56, 0.0 }
  0x40   :  { %v262_v56 = vmul.f32 %v807_v53, %v807_v53  ;;  %v997_v53 = vld [vmem:[%s1132_s0 + $0x1c8] sm:$0xff] }
  0x41   :  { %v151_v37 = vadd.f32 %v150_v25, %v149_v30  ;;  %v330_v24 = vadd.f32 %v329_v12, %v328_v16  ;;  %v168_v25 = vsel %vm86_vm1, %v837_v4, 0.0  ;;  %v347_v12 = vsel %vm86_vm1, %v254_v62, 0.0 }
  0x42   :  { %v263_v62 = vmul.f32 %v817_v59, %v817_v59  ;;  %v1007_v59 = vld [vmem:[%s1132_s0 + $0x1d0] sm:$0xff] }
  0x43   :  { %v153_v45 = vadd.f32 %v152_v33, %v151_v37  ;;  %v332_v31 = vadd.f32 %v331_v21, %v330_v24  ;;  %v170_v33 = vsel %vm86_vm1, %v847_v13, 0.0  ;;  %v349_v21 = vsel %vm86_vm1, %v255_v3, 0.0 }
  0x44   :  { %v264_v3 = vmul.f32 %v827_v63, %v827_v63  ;;  %v1017_v63 = vld [vmem:[%s1132_s0 + $0x1d8] sm:$0xff] }
  0x45   :  { %v155_v52 = vadd.f32 %v154_v40, %v153_v45  ;;  %v334_v39 = vadd.f32 %v333_v28, %v332_v31  ;;  %v172_v40 = vsel %vm86_vm1, %v857_v11, 0.0  ;;  %v351_v28 = vsel %vm86_vm1, %v256_v8, 0.0 }
  0x46   :  { %v265_v8 = vmul.f32 %v837_v4, %v837_v4  ;;  %v1027_v4 = vld [vmem:[%s1132_s0 + $0x1e0] sm:$0xff] }
  0x47   :  { %v157_v58 = vadd.f32 %v156_v48, %v155_v52  ;;  %v336_v46 = vadd.f32 %v335_v36, %v334_v39  ;;  %v174_v48 = vsel %vm86_vm1, %v867_v14, 0.0  ;;  %v353_v36 = vsel %vm86_vm1, %v257_v19, 0.0 }
  0x48   :  { %v266_v19 = vmul.f32 %v847_v13, %v847_v13  ;;  %v1037_v13 = vld [vmem:[%s1132_s0 + $0x1e8] sm:$0xff] }
  0x49   :  { %v159_v5 = vadd.f32 %v158_v55, %v157_v58  ;;  %v338_v54 = vadd.f32 %v337_v43, %v336_v46  ;;  %v176_v55 = vsel %vm86_vm1, %v877_v17, 0.0  ;;  %v355_v43 = vsel %vm86_vm1, %v258_v27, 0.0 }
  0x4a   :  { %v267_v27 = vmul.f32 %v857_v11, %v857_v11  ;;  %v1047_v11 = vld [vmem:[%s1132_s0 + $0x1f0] sm:$0xff] }
  0x4b   :  { %v161_v7 = vadd.f32 %v160_v61, %v159_v5  ;;  %v340_v60 = vadd.f32 %v339_v51, %v338_v54  ;;  %v178_v61 = vsel %vm86_vm1, %v887_v20, 0.0  ;;  %v357_v51 = vsel %vm86_vm1, %v259_v34, 0.0 }
  0x4c   :  { %v268_v34 = vmul.f32 %v867_v14, %v867_v14  ;;  %v1057_v14 = vld [vmem:[%s1132_s0 + $0x1f8] sm:$0xff] }
  0x4d   :  { %v163_v15 = vadd.f32 %v162_v1, %v161_v7  ;;  %v342_v0 = vadd.f32 %v341_v57, %v340_v60  ;;  %v180_v1 = vsel %vm86_vm1, %v897_v23, 0.0  ;;  %v359_v57 = vsel %vm86_vm1, %v260_v42, 0.0 }
  0x4e   :  { %v269_v42 = vmul.f32 %v877_v17, %v877_v17  ;;  %v212_v17 = vsel %vm86_vm1, %v1057_v14, 0.0 }
  0x4f   :  { %v165_v22 = vadd.f32 %v164_v10, %v163_v15  ;;  %v344_v9 = vadd.f32 %v343_v2, %v342_v0  ;;  %v182_v10 = vsel %vm86_vm1, %v907_v26, 0.0  ;;  %v361_v2 = vsel %vm86_vm1, %v261_v49, 0.0 }
  0x50   :  { %v270_v49 = vmul.f32 %v887_v20, %v887_v20 }
  0x51   :  { %v167_v30 = vadd.f32 %v166_v18, %v165_v22  ;;  %v346_v16 = vadd.f32 %v345_v6, %v344_v9  ;;  %v184_v18 = vsel %vm86_vm1, %v917_v29, 0.0  ;;  %v363_v6 = vsel %vm86_vm1, %v262_v56, 0.0 }
  0x52   :  { %v377_v56 = vsel %vm86_vm1, %v269_v42, 0.0 }
  0x53   :  { %v169_v37 = vadd.f32 %v168_v25, %v167_v30  ;;  %v348_v24 = vadd.f32 %v347_v12, %v346_v16  ;;  %v186_v25 = vsel %vm86_vm1, %v927_v32, 0.0  ;;  %v365_v12 = vsel %vm86_vm1, %v263_v62, 0.0 }
  0x55   :  { %v171_v45 = vadd.f32 %v170_v33, %v169_v37  ;;  %v350_v31 = vadd.f32 %v349_v21, %v348_v24  ;;  %v188_v33 = vsel %vm86_vm1, %v937_v35, 0.0  ;;  %v367_v21 = vsel %vm86_vm1, %v264_v3, 0.0 }
  0x57   :  { %v173_v52 = vadd.f32 %v172_v40, %v171_v45  ;;  %v352_v39 = vadd.f32 %v351_v28, %v350_v31  ;;  %v190_v40 = vsel %vm86_vm1, %v947_v38, 0.0  ;;  %v369_v28 = vsel %vm86_vm1, %v265_v8, 0.0 }
  0x59   :  { %v175_v58 = vadd.f32 %v174_v48, %v173_v52  ;;  %v354_v46 = vadd.f32 %v353_v36, %v352_v39  ;;  %v192_v48 = vsel %vm86_vm1, %v957_v41, 0.0  ;;  %v371_v36 = vsel %vm86_vm1, %v266_v19, 0.0 }
  0x5b   :  { %v177_v5 = vadd.f32 %v176_v55, %v175_v58  ;;  %v356_v54 = vadd.f32 %v355_v43, %v354_v46  ;;  %v194_v55 = vsel %vm86_vm1, %v967_v44, 0.0  ;;  %v373_v43 = vsel %vm86_vm1, %v267_v27, 0.0 }
  0x5d   :  { %v179_v7 = vadd.f32 %v178_v61, %v177_v5  ;;  %v358_v60 = vadd.f32 %v357_v51, %v356_v54  ;;  %v196_v61 = vsel %vm86_vm1, %v977_v47, 0.0  ;;  %v375_v51 = vsel %vm86_vm1, %v268_v34, 0.0 }
  0x5e   :  { %v281_v34 = vmul.f32 %v997_v53, %v997_v53 }
  0x5f   :  { %v181_v15 = vadd.f32 %v180_v1, %v179_v7  ;;  %v360_v0 = vadd.f32 %v359_v57, %v358_v60  ;;  %v198_v1 = vsel %vm86_vm1, %v987_v50, 0.0  ;;  %v272_v60 = vmul.f32 %v907_v26, %v907_v26 }
  0x60   :  { %v275_v26 = vmul.f32 %v937_v35, %v937_v35  ;;  %v278_v35 = vmul.f32 %v967_v44, %v967_v44  ;;  %v401_v42 = vsel %vm86_vm1, %v281_v34, 0.0 }
  0x61   :  { %v183_v22 = vadd.f32 %v182_v10, %v181_v15  ;;  %v362_v9 = vadd.f32 %v361_v2, %v360_v0  ;;  %v200_v10 = vsel %vm86_vm1, %v997_v53, 0.0  ;;  %v273_v2 = vmul.f32 %v917_v29, %v917_v29 }
  0x62   :  { %v383_v3 = vsel %vm86_vm1, %v272_v60, 0.0  ;;  %v276_v29 = vmul.f32 %v947_v38, %v947_v38  ;;  %v279_v38 = vmul.f32 %v977_v47, %v977_v47  ;;  %v282_v47 = vmul.f32 %v1007_v59, %v1007_v59 }
  0x63   :  { %v185_v30 = vadd.f32 %v184_v18, %v183_v22  ;;  %v364_v16 = vadd.f32 %v363_v6, %v362_v9  ;;  %v202_v18 = vsel %vm86_vm1, %v1007_v59, 0.0  ;;  %v385_v9 = vsel %vm86_vm1, %v273_v2, 0.0 }
  0x64   :  { %v403_v53 = vsel %vm86_vm1, %v282_v47, 0.0 }
  0x65   :  { %v187_v37 = vadd.f32 %v186_v25, %v185_v30  ;;  %v366_v24 = vadd.f32 %v365_v12, %v364_v16  ;;  %v204_v25 = vsel %vm86_vm1, %v1017_v63, 0.0 }
  0x67   :  { %v189_v45 = vadd.f32 %v188_v33, %v187_v37  ;;  %v368_v31 = vadd.f32 %v367_v21, %v366_v24  ;;  %v206_v33 = vsel %vm86_vm1, %v1027_v4, 0.0  ;;  %v391_v24 = vsel %vm86_vm1, %v276_v29, 0.0 }
  0x69   :  { %v191_v52 = vadd.f32 %v190_v40, %v189_v45  ;;  %v370_v39 = vadd.f32 %v369_v28, %v368_v31  ;;  %v208_v40 = vsel %vm86_vm1, %v1037_v13, 0.0  ;;  %v280_v31 = vmul.f32 %v987_v50, %v987_v50 }
  0x6a   :  { %v283_v50 = vmul.f32 %v1017_v63, %v1017_v63 }
  0x6b   :  { %v193_v58 = vadd.f32 %v192_v48, %v191_v52  ;;  %v372_v46 = vadd.f32 %v371_v36, %v370_v39  ;;  %v210_v48 = vsel %vm86_vm1, %v1047_v11, 0.0  ;;  %v397_v36 = vsel %vm86_vm1, %v279_v38, 0.0 }
  0x6c   :  { %v399_v39 = vsel %vm86_vm1, %v280_v31, 0.0  ;;  %v405_v59 = vsel %vm86_vm1, %v283_v50, 0.0 }
  0x6d   :  { %v195_v5 = vadd.f32 %v194_v55, %v193_v58  ;;  %v374_v54 = vadd.f32 %v373_v43, %v372_v46  ;;  %v271_v55 = vmul.f32 %v897_v23, %v897_v23  ;;  %v274_v23 = vmul.f32 %v927_v32, %v927_v32 }
  0x6e   :  { %v277_v32 = vmul.f32 %v957_v41, %v957_v41 }
  0x6f   :  { %v197_v7 = vadd.f32 %v196_v61, %v195_v5  ;;  %v376_v58 = vadd.f32 %v375_v51, %v374_v54  ;;  %v379_v61 = vsel %vm86_vm1, %v270_v49, 0.0  ;;  %v381_v5 = vsel %vm86_vm1, %v271_v55, 0.0 }
  0x70   :  { %v387_v12 = vsel %vm86_vm1, %v274_v23, 0.0  ;;  %v393_v28 = vsel %vm86_vm1, %v277_v32, 0.0  ;;  %v286_v51 = vmul.f32 %v1047_v11, %v1047_v11  ;;  %v287_v54 = vmul.f32 %v1057_v14, %v1057_v14 }
  0x71   :  { %v199_v15 = vadd.f32 %v198_v1, %v197_v7  ;;  %v378_v62 = vadd.f32 %v377_v56, %v376_v58 }
  0x72   :  { %v411_v55 = vsel %vm86_vm1, %v286_v51, 0.0 }
  0x73   :  { %v201_v22 = vadd.f32 %v200_v10, %v199_v15  ;;  %v380_v1 = vadd.f32 %v379_v61, %v378_v62 }
  0x75   :  { %v203_v30 = vadd.f32 %v202_v18, %v201_v22  ;;  %v382_v7 = vadd.f32 %v381_v5, %v380_v1  ;;  %v389_v18 = vsel %vm86_vm1, %v275_v26, 0.0  ;;  %v85_v22 = vld [vmem:[#allocation2] sm:$0x1]  ;;  %v223_v5 = vld [vmem:[#allocation2 + $0x1] sm:$0x1] }
  0x77   :  { %v205_v37 = vadd.f32 %v204_v25, %v203_v30  ;;  %v384_v8 = vadd.f32 %v383_v3, %v382_v7 }
  0x79   :  { %v207_v45 = vadd.f32 %v206_v33, %v205_v37  ;;  %v386_v16 = vadd.f32 %v385_v9, %v384_v8  ;;  %v395_v33 = vsel %vm86_vm1, %v278_v35, 0.0 }
  0x7b   :  { %v209_v52 = vadd.f32 %v208_v40, %v207_v45  ;;  %v388_v21 = vadd.f32 %v387_v12, %v386_v16  ;;  %v284_v45 = vmul.f32 %v1027_v4, %v1027_v4  ;;  %v438_v12 = vld [vmem:[%s1134_s2] sm:$0x1] }
  0x7d   :  { %v211_v57 = vadd.f32 %v210_v48, %v209_v52  ;;  %v390_v27 = vadd.f32 %v389_v18, %v388_v21  ;;  %v285_v48 = vmul.f32 %v1037_v13, %v1037_v13  ;;  %v407_v63 = vsel %vm86_vm1, %v284_v45, 0.0 }
  0x7e   :  { %v413_v13 = vsel %vm86_vm1, %v287_v54, 0.0 }
  0x7f   :  { %v213_v20 = vadd.f32 %v212_v17, %v211_v57  ;;  %v392_v41 = vadd.f32 %v391_v24, %v390_v27  ;;  %v409_v4 = vsel %vm86_vm1, %v285_v48, 0.0 }
  0x81   :  { %v214_v0 = vrot.slane %v213_v20, 4  ;;  %v394_v44 = vadd.f32 %v393_v28, %v392_v41 }
  0x83   :  { %v215_v6 = vadd.f32 %v214_v0, %v213_v20  ;;  %v396_v37 = vadd.f32 %v395_v33, %v394_v44 }
  0x85   :  { %v216_v10 = vrot.slane %v215_v6, 2  ;;  %v398_v40 = vadd.f32 %v397_v36, %v396_v37 }
  0x87   :  { %v217_v15 = vadd.f32 %v216_v10, %v215_v6  ;;  %v400_v43 = vadd.f32 %v399_v39, %v398_v40  ;;  %v433_v10 = vld [vmem:[%s1133_s1] sm:$0x1] }
  0x89   :  { %v218_v19 = vrot.slane %v217_v15, 1  ;;  %v402_v46 = vadd.f32 %v401_v42, %v400_v43 }
  0x8b   :  { %v219_v25 = vadd.f32 %v218_v19, %v217_v15  ;;  %v404_v49 = vadd.f32 %v403_v53, %v402_v46 }
  0x8d   :  { %v220_v30 = vadd.f32 %v219_v25, %v85_v22  ;;  %v406_v52 = vadd.f32 %v405_v59, %v404_v49 }
  0x8f   :  { %222 = vst.msk [vmem:[#allocation2] sm:$0x1] %vm221_vm2, %v220_v30  ;;  %v408_v17 = vadd.f32 %v407_v63, %v406_v52 }
  0x91   :  { %v410_v56 = vadd.f32 %v409_v4, %v408_v17 }
  0x93   :  { %v412_v57 = vadd.f32 %v411_v55, %v410_v56 }
  0x95   :  { %v414_v58 = vadd.f32 %v413_v13, %v412_v57 }
  0x96   :  { %v426_v1 = vld [vmem:[#allocation2] sm:$0x1] }
  0x97   :  { %v415_v60 = vrot.slane %v414_v58, 4  ;;  %v427_v14 = vmul.f32 0.001953125, %v426_v1 }
  0x99   :  { %v416_v61 = vadd.f32 %v415_v60, %v414_v58  ;;  %v430_v23 = vmul.f32 %v427_v14, %v427_v14 }
  0x9b   :  { %v417_v20 = vrot.slane %v416_v61, 2 }
  0x9d   :  { %v418_v11 = vadd.f32 %v417_v20, %v416_v61 }
  0x9f   :  { %v419_v62 = vrot.slane %v418_v11, 1 }
  0xa1   :  { %v420_v2 = vadd.f32 %v419_v62, %v418_v11 }
  0xa3   :  { %v421_v0 = vadd.f32 %v420_v2, %v223_v5 }
  0xa5   :  { %422 = vst.msk [vmem:[#allocation2 + $0x1] sm:$0x1] %vm221_vm2, %v421_v0 }
  0xac   :  { %v428_v3 = vld [vmem:[#allocation2 + $0x1] sm:$0x1] }
  0xad   :  { %v429_v6 = vmul.f32 0.001953125, %v428_v3 }
  0xaf   :  { %v431_v7 = vsub.f32 %v429_v6, %v430_v23 }
  0xb1   :  { %v432_v26 = vmax.f32 %v431_v7, 0.0 }
  0xb3   :  { %v434_v9 = vadd.f32 1e-05, %v432_v26 }
  0xb5   :  { %458 = vrsqrt.f32 %v434_v9 }
  0xc2   :  { %v459_v8 = vpop.eup %458 }
  0xc3   :  { %v436_v29 = vmul.f32 %v459_v8, %v433_v10 }
  0xc5   :  { %437 = vst.msk [vmem:[#allocation3] sm:$0x1] %vm221_vm2, %v436_v29  ;;  %v439_v15 = vmul.f32 %v436_v29, %v427_v14 }
  0xc7   :  { %v440_v16 = vsub.f32 %v438_v12, %v439_v15 }
  0xc9   :  { %441 = vst.msk [vmem:[#allocation3 + $0x1] sm:$0x1] %vm221_vm2, %v440_v16 }
  0xca   :  { %471 = shalt.err (!%p468_p4)
}
  0xcb   :  { %451 = dma.vmem_to_hbm [thread:$0]  %s449_s9, 32, %s1135_s3, [#allocation4]  }
  0xcc   :  { %480 = dma.done.wait [#allocation4], 32  }
  0xcd   :  { %481 = vsyncadd [#allocation4], 4294967264 }
  0xce   :  { %455 = vsyncpa [#allocation4], 1 }

</bundles_post_ra>
